<compile_context>
chip_gen: v7x
topology: tpu7x:2x2x1
jax: 0.10.0
libtpu: 0.0.40
codegen_flags: <defaults>
</compile_context>

<pallas_src>
import functools
from typing import List

import numpy as np
import jax
import jax.numpy as jnp
from jax.experimental import pallas as pl
from jax.experimental.pallas import tpu as pltpu


def _offsets(in_features) -> np.ndarray:
    # Static (python/numpy) computation -- safe under jit tracing.
    return np.concatenate(
        ([0], np.cumsum(np.asarray(in_features))[:-1])).astype(np.int32)


def deepfm_kernel(z_ref, lin_ref, sel_ref,
                  w11_ref, b11_ref, w12_ref, b12_ref,
                  w21_ref, b21_ref, w22_ref, b22_ref,
                  w3_ref, out_ref):
    """All activations carry batch on the lane (last) axis.

    z_ref   : (FH, TB) f32  embeddings^T tile
    lin_ref : (1, TB)  f32  per-row linear field-sum + lin_bias + final bias
    sel_ref : (H, FH)  f32  0/1 field selector (sum over fields as a matmul)
    w*_ref  : transposed MLP weights (f32); b*_ref column biases (f32)
    w3_ref  : (H, 1)   f32  final linear weight (used elementwise)
    out_ref : (1, TB)  f32
    """
    z = z_ref[...]                                                # (FH, TB) f32

    # ---- factorization machine term -> (1, TB)
    field_sum = jnp.dot(sel_ref[...], z,
                        preferred_element_type=jnp.float32)       # (H, TB)
    sos = jnp.sum(field_sum * field_sum, axis=0, keepdims=True)   # (1, TB)
    ss = jnp.sum(z * z, axis=0, keepdims=True)                    # (1, TB)
    fm = 0.5 * (sos - ss)

    # ---- deep MLP term -> (1, TB); f32 MXU matmuls
    h = jnp.dot(w11_ref[...], z,
                preferred_element_type=jnp.float32) + b11_ref[...]
    h = jax.nn.gelu(h, approximate=True)
    h = jnp.dot(w12_ref[...], h,
                preferred_element_type=jnp.float32) + b12_ref[...]
    h = jnp.dot(w21_ref[...], h,
                preferred_element_type=jnp.float32) + b21_ref[...]
    h = jax.nn.gelu(h, approximate=True)
    h = jnp.dot(w22_ref[...], h,
                preferred_element_type=jnp.float32) + b22_ref[...]
    mlp = jnp.sum(h * w3_ref[...], axis=0, keepdims=True)         # (1, TB)

    # ---- combine + sigmoid, lane-dense store
    out_ref[...] = jax.nn.sigmoid(lin_ref[...] + fm + mlp)


def init_params(key, in_features: List[int], hidden_features: int):
    total = int(sum(in_features))
    F = len(in_features)
    FH = F * hidden_features
    ks = jax.random.split(key, 12)
    scale = 0.05
    return {
        # embedding tables
        "emb_table": jax.random.normal(ks[0], (total, hidden_features), jnp.float32) * scale,
        "lin_table": jax.random.normal(ks[1], (total, 1), jnp.float32) * scale,
        "lin_bias": jnp.zeros((1, 1), jnp.float32),
        # MLP #1
        "w11": jax.random.normal(ks[2], (FH, FH), jnp.float32) * scale,
        "b11": jax.random.normal(ks[3], (1, FH), jnp.float32) * scale,
        "w12": jax.random.normal(ks[4], (FH, hidden_features), jnp.float32) * scale,
        "b12": jax.random.normal(ks[5], (1, hidden_features), jnp.float32) * scale,
        # MLP #2
        "w21": jax.random.normal(ks[6], (hidden_features, hidden_features), jnp.float32) * scale,
        "b21": jax.random.normal(ks[7], (1, hidden_features), jnp.float32) * scale,
        "w22": jax.random.normal(ks[8], (hidden_features, hidden_features), jnp.float32) * scale,
        "b22": jax.random.normal(ks[9], (1, hidden_features), jnp.float32) * scale,
        # final linear
        "w3": jax.random.normal(ks[10], (hidden_features, 1), jnp.float32) * scale,
        "b3": jax.random.normal(ks[11], (1, 1), jnp.float32) * scale,
    }


@functools.partial(jax.jit,
                   static_argnames=("in_features", "hidden_features", "block_b"))
def deepfm_forward(x, params, in_features, hidden_features, block_b=256):
    """x: (B, F) int32 indices. Returns (B,) f32 probabilities."""
    B, F = x.shape
    H = hidden_features
    FH = F * H

    # static offsets (numpy) -> no tracer .tolist()
    offsets = jnp.asarray(_offsets(in_features))
    idx = x.astype(jnp.int32) + offsets[None, :]                  # (B, F)

    # glue: embedding gathers (pure indexing, stays in JAX)
    emb = jnp.take(params["emb_table"], idx, axis=0)              # (B, F, H) f32
    emb_T = jnp.transpose(emb, (1, 2, 0)).reshape(FH, B)          # (FH, B)
    lin_sum = jnp.sum(jnp.take(params["lin_table"], idx, axis=0)[..., 0], axis=1)  # (B,)
    # fold lin_bias and the final Linear bias into the lane-dense linear row
    lin_row = (lin_sum + params["lin_bias"][0, 0] + params["b3"][0, 0])[None, :]   # (1, B)

    # pad batch to a multiple of the lane tile
    tb = block_b
    n_tiles = pl.cdiv(B, tb)
    b_pad = n_tiles * tb
    emb_T = jnp.pad(emb_T, ((0, 0), (0, b_pad - B))).astype(jnp.float32)
    lin_row = jnp.pad(lin_row, ((0, 0), (0, b_pad - B)))

    # constant 0/1 field selector: sel[h, f*H + h'] = (h == h')
    sel = jnp.tile(jnp.eye(H, dtype=jnp.float32), (1, F))

    f32 = jnp.float32
    w11_t = params["w11"].T.astype(f32); b11_c = params["b11"].T   # (FH,FH),(FH,1)
    w12_t = params["w12"].T.astype(f32); b12_c = params["b12"].T   # (H,FH),(H,1)
    w21_t = params["w21"].T.astype(f32); b21_c = params["b21"].T   # (H,H),(H,1)
    w22_t = params["w22"].T.astype(f32); b22_c = params["b22"].T   # (H,H),(H,1)
    w3_c = params["w3"]                                            # (H,1) f32

    act_spec = pl.BlockSpec((FH, tb), lambda i: (0, i))
    row_spec = pl.BlockSpec((1, tb), lambda i: (0, i))

    def resident(shape):
        # full-array block, constant index_map -> stays resident across grid steps
        return pl.BlockSpec(shape, lambda i: (0, 0))

    out = pl.pallas_call(
        deepfm_kernel,
        grid=(n_tiles,),
        out_shape=jax.ShapeDtypeStruct((1, b_pad), jnp.float32),
        in_specs=[
            act_spec,                                  # emb_T tile
            row_spec,                                  # linear row
            resident((H, FH)),                         # selector
            resident((FH, FH)), resident((FH, 1)),     # w11^T, b11
            resident((H, FH)),  resident((H, 1)),      # w12^T, b12
            resident((H, H)),   resident((H, 1)),      # w21^T, b21
            resident((H, H)),   resident((H, 1)),      # w22^T, b22
            resident((H, 1)),                          # w3
        ],
        out_specs=row_spec,
        compiler_params=pltpu.CompilerParams(
            dimension_semantics=("parallel",)),
    )(emb_T, lin_row, sel,
      w11_t, b11_c, w12_t, b12_c, w21_t, b21_c, w22_t, b22_c, w3_c)

    return out[0, :B]


def deepfm_reference(x, params, in_features, hidden_features):
    """Pure-JAX f32 reference of the PyTorch forward (erf GELU)."""
    B, F = x.shape
    H = hidden_features
    offsets = jnp.asarray(_offsets(in_features))
    idx = x.astype(jnp.int32) + offsets[None, :]
    emb = jnp.take(params["emb_table"], idx, axis=0)
    lin = jnp.sum(jnp.take(params["lin_table"], idx, axis=0), axis=1) + params["lin_bias"][0]
    sos = jnp.sum(emb, axis=1) ** 2
    ss = jnp.sum(emb ** 2, axis=1)
    fm = 0.5 * jnp.sum(sos - ss, axis=1, keepdims=True)
    h = emb.reshape(B, F * H)
    h = jax.nn.gelu(h @ params["w11"] + params["b11"], approximate=False)
    h = h @ params["w12"] + params["b12"]
    h = jax.nn.gelu(h @ params["w21"] + params["b21"], approximate=False)
    h = h @ params["w22"] + params["b22"]
    mlp = h @ params["w3"] + params["b3"]
    return jax.nn.sigmoid((lin + fm + mlp)[:, 0])


if __name__ == "__main__":
    in_features = (10, 20, 30, 40)   # 4 categorical fields
    hidden_features = 16
    B = 8
    F = len(in_features)

    key = jax.random.PRNGKey(0)
    kparams, kx = jax.random.split(key)
    params = init_params(kparams, list(in_features), hidden_features)

    # deterministic integer field indices, each within its own cardinality
    cols = []
    for f, card in enumerate(in_features):
        cols.append(jax.random.randint(jax.random.fold_in(kx, f), (B,), 0, card,
                                       dtype=jnp.int32))
    x = jnp.stack(cols, axis=1)                                  # (B, F) int32

    out = deepfm_forward(x, params, in_features, hidden_features)
    out = jax.block_until_ready(out)

    ref = deepfm_reference(x, params, in_features, hidden_features)
    assert out.shape == (B,)
    # tanh-GELU in the kernel vs f32/erf reference -> slightly loosened tolerance
    assert jnp.allclose(out, ref, atol=5e-3, rtol=1e-3), (out, ref)

    print("KERNEL_OK")
</pallas_src>

<mosaic_0001>
module attributes {stable_mosaic.version = 11 : i64} {
  func.func @deepfm_kernel(%arg0: i32, %arg1: memref<64x256xf32, #tpu.memory_space<vmem>>, %arg2: memref<1x256xf32, #tpu.memory_space<vmem>>, %arg3: memref<16x64xf32, #tpu.memory_space<vmem>>, %arg4: memref<64x64xf32, #tpu.memory_space<vmem>>, %arg5: memref<64x1xf32, #tpu.memory_space<vmem>>, %arg6: memref<16x64xf32, #tpu.memory_space<vmem>>, %arg7: memref<16x1xf32, #tpu.memory_space<vmem>>, %arg8: memref<16x16xf32, #tpu.memory_space<vmem>>, %arg9: memref<16x1xf32, #tpu.memory_space<vmem>>, %arg10: memref<16x16xf32, #tpu.memory_space<vmem>>, %arg11: memref<16x1xf32, #tpu.memory_space<vmem>>, %arg12: memref<16x1xf32, #tpu.memory_space<vmem>>, %arg13: memref<1x256xf32, #tpu.memory_space<vmem>>) attributes {dimension_semantics = [#tpu.dimension_semantics<parallel>], iteration_bounds = array<i64: 1>, scalar_prefetch = 0 : i64, scratch_operands = 0 : i64, tpu.core_type = #tpu.core_type<tc>, window_params = [{transform_indices = @transform_0, window_bounds = array<i64: 64, 256>}, {transform_indices = @transform_1, window_bounds = array<i64: 1, 256>}, {pipeline_mode = #tpu.pipeline_mode<synchronous>, transform_indices = @transform_2, window_bounds = array<i64: 16, 64>}, {pipeline_mode = #tpu.pipeline_mode<synchronous>, transform_indices = @transform_3, window_bounds = array<i64: 64, 64>}, {pipeline_mode = #tpu.pipeline_mode<synchronous>, transform_indices = @transform_4, window_bounds = array<i64: 64, 1>}, {pipeline_mode = #tpu.pipeline_mode<synchronous>, transform_indices = @transform_5, window_bounds = array<i64: 16, 64>}, {pipeline_mode = #tpu.pipeline_mode<synchronous>, transform_indices = @transform_6, window_bounds = array<i64: 16, 1>}, {pipeline_mode = #tpu.pipeline_mode<synchronous>, transform_indices = @transform_7, window_bounds = array<i64: 16, 16>}, {pipeline_mode = #tpu.pipeline_mode<synchronous>, transform_indices = @transform_8, window_bounds = array<i64: 16, 1>}, {pipeline_mode = #tpu.pipeline_mode<synchronous>, transform_indices = @transform_9, window_bounds = array<i64: 16, 16>}, {pipeline_mode = #tpu.pipeline_mode<synchronous>, transform_indices = @transform_10, window_bounds = array<i64: 16, 1>}, {pipeline_mode = #tpu.pipeline_mode<synchronous>, transform_indices = @transform_11, window_bounds = array<i64: 16, 1>}, {transform_indices = @transform_12, window_bounds = array<i64: 1, 256>}]} {
    %c0 = arith.constant 0 : index
    %c0_0 = arith.constant 0 : index
    %0 = vector.load %arg1[%c0, %c0_0] : memref<64x256xf32, #tpu.memory_space<vmem>>, vector<64x256xf32>
    %c0_1 = arith.constant 0 : index
    %c0_2 = arith.constant 0 : index
    %1 = vector.load %arg3[%c0_1, %c0_2] : memref<16x64xf32, #tpu.memory_space<vmem>>, vector<16x64xf32>
    %cst = arith.constant dense<0.000000e+00> : vector<16x256xf32>
    %2 = tpu.matmul %1, %0, %cst {dimension_numbers = #tpu.dot_dimension_numbers<[1], [0], [0], [1], [0, 0, 1, 1], [], []>} : vector<16x64xf32>, vector<64x256xf32>, vector<16x256xf32> -> vector<16x256xf32>
    %3 = arith.mulf %2, %2 : vector<16x256xf32>
    %cst_3 = arith.constant dense<0.000000e+00> : vector<256xf32>
    %4 = vector.multi_reduction <add>, %3, %cst_3 [0] : vector<16x256xf32> to vector<256xf32>
    %5 = vector.shape_cast %4 : vector<256xf32> to vector<1x256xf32>
    %6 = arith.mulf %0, %0 : vector<64x256xf32>
    %cst_4 = arith.constant dense<0.000000e+00> : vector<256xf32>
    %7 = vector.multi_reduction <add>, %6, %cst_4 [0] : vector<64x256xf32> to vector<256xf32>
    %8 = vector.shape_cast %7 : vector<256xf32> to vector<1x256xf32>
    %9 = arith.subf %5, %8 : vector<1x256xf32>
    %cst_5 = arith.constant 5.000000e-01 : f32
    %10 = vector.broadcast %cst_5 : f32 to vector<1x256xf32>
    %11 = arith.mulf %10, %9 : vector<1x256xf32>
    %c0_6 = arith.constant 0 : index
    %c0_7 = arith.constant 0 : index
    %12 = vector.load %arg4[%c0_6, %c0_7] : memref<64x64xf32, #tpu.memory_space<vmem>>, vector<64x64xf32>
    %cst_8 = arith.constant dense<0.000000e+00> : vector<64x256xf32>
    %13 = tpu.matmul %12, %0, %cst_8 {dimension_numbers = #tpu.dot_dimension_numbers<[1], [0], [0], [1], [0, 0, 1, 1], [], []>} : vector<64x64xf32>, vector<64x256xf32>, vector<64x256xf32> -> vector<64x256xf32>
    %c0_9 = arith.constant 0 : index
    %c0_10 = arith.constant 0 : index
    %14 = vector.load %arg5[%c0_9, %c0_10] : memref<64x1xf32, #tpu.memory_space<vmem>>, vector<64x1xf32>
    %15 = vector.broadcast %14 : vector<64x1xf32> to vector<64x256xf32>
    %16 = arith.addf %13, %15 : vector<64x256xf32>
    %17 = arith.mulf %16, %16 : vector<64x256xf32>
    %18 = arith.mulf %16, %17 : vector<64x256xf32>
    %cst_11 = arith.constant 4.471500e-02 : f32
    %19 = vector.broadcast %cst_11 : f32 to vector<64x256xf32>
    %20 = arith.mulf %19, %18 : vector<64x256xf32>
    %21 = arith.addf %16, %20 : vector<64x256xf32>
    %cst_12 = arith.constant 0.797884583 : f32
    %22 = vector.broadcast %cst_12 : f32 to vector<64x256xf32>
    %23 = arith.mulf %22, %21 : vector<64x256xf32>
    %24 = math.tanh %23 : vector<64x256xf32>
    %cst_13 = arith.constant 1.000000e+00 : f32
    %25 = vector.broadcast %cst_13 : f32 to vector<64x256xf32>
    %26 = arith.addf %25, %24 : vector<64x256xf32>
    %cst_14 = arith.constant 5.000000e-01 : f32
    %27 = vector.broadcast %cst_14 : f32 to vector<64x256xf32>
    %28 = arith.mulf %27, %26 : vector<64x256xf32>
    %29 = arith.mulf %16, %28 : vector<64x256xf32>
    %c0_15 = arith.constant 0 : index
    %c0_16 = arith.constant 0 : index
    %30 = vector.load %arg6[%c0_15, %c0_16] : memref<16x64xf32, #tpu.memory_space<vmem>>, vector<16x64xf32>
    %cst_17 = arith.constant dense<0.000000e+00> : vector<16x256xf32>
    %31 = tpu.matmul %30, %29, %cst_17 {dimension_numbers = #tpu.dot_dimension_numbers<[1], [0], [0], [1], [0, 0, 1, 1], [], []>} : vector<16x64xf32>, vector<64x256xf32>, vector<16x256xf32> -> vector<16x256xf32>
    %c0_18 = arith.constant 0 : index
    %c0_19 = arith.constant 0 : index
    %32 = vector.load %arg7[%c0_18, %c0_19] : memref<16x1xf32, #tpu.memory_space<vmem>>, vector<16x1xf32>
    %33 = vector.broadcast %32 : vector<16x1xf32> to vector<16x256xf32>
    %34 = arith.addf %31, %33 : vector<16x256xf32>
    %c0_20 = arith.constant 0 : index
    %c0_21 = arith.constant 0 : index
    %35 = vector.load %arg8[%c0_20, %c0_21] : memref<16x16xf32, #tpu.memory_space<vmem>>, vector<16x16xf32>
    %cst_22 = arith.constant dense<0.000000e+00> : vector<16x256xf32>
    %36 = tpu.matmul %35, %34, %cst_22 {dimension_numbers = #tpu.dot_dimension_numbers<[1], [0], [0], [1], [0, 0, 1, 1], [], []>} : vector<16x16xf32>, vector<16x256xf32>, vector<16x256xf32> -> vector<16x256xf32>
    %c0_23 = arith.constant 0 : index
    %c0_24 = arith.constant 0 : index
    %37 = vector.load %arg9[%c0_23, %c0_24] : memref<16x1xf32, #tpu.memory_space<vmem>>, vector<16x1xf32>
    %38 = vector.broadcast %37 : vector<16x1xf32> to vector<16x256xf32>
    %39 = arith.addf %36, %38 : vector<16x256xf32>
    %40 = arith.mulf %39, %39 : vector<16x256xf32>
    %41 = arith.mulf %39, %40 : vector<16x256xf32>
    %cst_25 = arith.constant 4.471500e-02 : f32
    %42 = vector.broadcast %cst_25 : f32 to vector<16x256xf32>
    %43 = arith.mulf %42, %41 : vector<16x256xf32>
    %44 = arith.addf %39, %43 : vector<16x256xf32>
    %cst_26 = arith.constant 0.797884583 : f32
    %45 = vector.broadcast %cst_26 : f32 to vector<16x256xf32>
    %46 = arith.mulf %45, %44 : vector<16x256xf32>
    %47 = math.tanh %46 : vector<16x256xf32>
    %cst_27 = arith.constant 1.000000e+00 : f32
    %48 = vector.broadcast %cst_27 : f32 to vector<16x256xf32>
    %49 = arith.addf %48, %47 : vector<16x256xf32>
    %cst_28 = arith.constant 5.000000e-01 : f32
    %50 = vector.broadcast %cst_28 : f32 to vector<16x256xf32>
    %51 = arith.mulf %50, %49 : vector<16x256xf32>
    %52 = arith.mulf %39, %51 : vector<16x256xf32>
    %c0_29 = arith.constant 0 : index
    %c0_30 = arith.constant 0 : index
    %53 = vector.load %arg10[%c0_29, %c0_30] : memref<16x16xf32, #tpu.memory_space<vmem>>, vector<16x16xf32>
    %cst_31 = arith.constant dense<0.000000e+00> : vector<16x256xf32>
    %54 = tpu.matmul %53, %52, %cst_31 {dimension_numbers = #tpu.dot_dimension_numbers<[1], [0], [0], [1], [0, 0, 1, 1], [], []>} : vector<16x16xf32>, vector<16x256xf32>, vector<16x256xf32> -> vector<16x256xf32>
    %c0_32 = arith.constant 0 : index
    %c0_33 = arith.constant 0 : index
    %55 = vector.load %arg11[%c0_32, %c0_33] : memref<16x1xf32, #tpu.memory_space<vmem>>, vector<16x1xf32>
    %56 = vector.broadcast %55 : vector<16x1xf32> to vector<16x256xf32>
    %57 = arith.addf %54, %56 : vector<16x256xf32>
    %c0_34 = arith.constant 0 : index
    %c0_35 = arith.constant 0 : index
    %58 = vector.load %arg12[%c0_34, %c0_35] : memref<16x1xf32, #tpu.memory_space<vmem>>, vector<16x1xf32>
    %59 = vector.broadcast %58 : vector<16x1xf32> to vector<16x256xf32>
    %60 = arith.mulf %57, %59 : vector<16x256xf32>
    %cst_36 = arith.constant dense<0.000000e+00> : vector<256xf32>
    %61 = vector.multi_reduction <add>, %60, %cst_36 [0] : vector<16x256xf32> to vector<256xf32>
    %62 = vector.shape_cast %61 : vector<256xf32> to vector<1x256xf32>
    %c0_37 = arith.constant 0 : index
    %c0_38 = arith.constant 0 : index
    %63 = vector.load %arg2[%c0_37, %c0_38] : memref<1x256xf32, #tpu.memory_space<vmem>>, vector<1x256xf32>
    %64 = arith.addf %63, %11 : vector<1x256xf32>
    %65 = arith.addf %64, %62 : vector<1x256xf32>
    %66 = arith.negf %65 : vector<1x256xf32>
    %67 = math.exp %66 : vector<1x256xf32>
    %cst_39 = arith.constant 1.000000e+00 : f32
    %68 = vector.broadcast %cst_39 : f32 to vector<1x256xf32>
    %69 = arith.addf %68, %67 : vector<1x256xf32>
    %70 = arith.divf %68, %69 : vector<1x256xf32>
    %c0_40 = arith.constant 0 : index
    %c0_41 = arith.constant 0 : index
    %71 = vector.load %arg13[%c0_40, %c0_41] : memref<1x256xf32, #tpu.memory_space<vmem>>, vector<1x256xf32>
    tpu.vector_store %arg13[%c0_40, %c0_41], %70 {strides = array<i32>} : memref<1x256xf32, #tpu.memory_space<vmem>>, vector<1x256xf32>,
    return
  }
  func.func @transform_0(%arg0: i32) -> (i32, i32) {
    %c0_i32 = arith.constant 0 : i32
    %c0_i32_0 = arith.constant 0 : i32
    return %c0_i32, %arg0 : i32, i32
  }
  func.func @transform_1(%arg0: i32) -> (i32, i32) {
    %c0_i32 = arith.constant 0 : i32
    %c0_i32_0 = arith.constant 0 : i32
    return %c0_i32, %arg0 : i32, i32
  }
  func.func @transform_2(%arg0: i32) -> (i32, i32) {
    %c0_i32 = arith.constant 0 : i32
    %c0_i32_0 = arith.constant 0 : i32
    %c0_i32_1 = arith.constant 0 : i32
    return %c0_i32, %c0_i32_0 : i32, i32
  }
  func.func @transform_3(%arg0: i32) -> (i32, i32) {
    %c0_i32 = arith.constant 0 : i32
    %c0_i32_0 = arith.constant 0 : i32
    %c0_i32_1 = arith.constant 0 : i32
    return %c0_i32, %c0_i32_0 : i32, i32
  }
  func.func @transform_4(%arg0: i32) -> (i32, i32) {
    %c0_i32 = arith.constant 0 : i32
    %c0_i32_0 = arith.constant 0 : i32
    %c0_i32_1 = arith.constant 0 : i32
    return %c0_i32, %c0_i32_0 : i32, i32
  }
  func.func @transform_5(%arg0: i32) -> (i32, i32) {
    %c0_i32 = arith.constant 0 : i32
    %c0_i32_0 = arith.constant 0 : i32
    %c0_i32_1 = arith.constant 0 : i32
    return %c0_i32, %c0_i32_0 : i32, i32
  }
  func.func @transform_6(%arg0: i32) -> (i32, i32) {
    %c0_i32 = arith.constant 0 : i32
    %c0_i32_0 = arith.constant 0 : i32
    %c0_i32_1 = arith.constant 0 : i32
    return %c0_i32, %c0_i32_0 : i32, i32
  }
  func.func @transform_7(%arg0: i32) -> (i32, i32) {
    %c0_i32 = arith.constant 0 : i32
    %c0_i32_0 = arith.constant 0 : i32
    %c0_i32_1 = arith.constant 0 : i32
    return %c0_i32, %c0_i32_0 : i32, i32
  }
  func.func @transform_8(%arg0: i32) -> (i32, i32) {
    %c0_i32 = arith.constant 0 : i32
    %c0_i32_0 = arith.constant 0 : i32
    %c0_i32_1 = arith.constant 0 : i32
    return %c0_i32, %c0_i32_0 : i32, i32
  }
  func.func @transform_9(%arg0: i32) -> (i32, i32) {
    %c0_i32 = arith.constant 0 : i32
    %c0_i32_0 = arith.constant 0 : i32
    %c0_i32_1 = arith.constant 0 : i32
    return %c0_i32, %c0_i32_0 : i32, i32
  }
  func.func @transform_10(%arg0: i32) -> (i32, i32) {
    %c0_i32 = arith.constant 0 : i32
    %c0_i32_0 = arith.constant 0 : i32
    %c0_i32_1 = arith.constant 0 : i32
    return %c0_i32, %c0_i32_0 : i32, i32
  }
  func.func @transform_11(%arg0: i32) -> (i32, i32) {
    %c0_i32 = arith.constant 0 : i32
    %c0_i32_0 = arith.constant 0 : i32
    %c0_i32_1 = arith.constant 0 : i32
    return %c0_i32, %c0_i32_0 : i32, i32
  }
  func.func @transform_12(%arg0: i32) -> (i32, i32) {
    %c0_i32 = arith.constant 0 : i32
    %c0_i32_0 = arith.constant 0 : i32
    return %c0_i32, %arg0 : i32, i32
  }
}

</mosaic_0001>

<bundles_post_ra>
// kernel: tile.9
= control target key start
LH: loop header
LB: loop body
LE: loop exit
PB: predicated region body
PF: predicated region fallthrough
CT: control target
= control target key end

     0   :  { %vm82_vm0 = vcmask 1047556   ;;  %vm84_vm1 = vcmask 130048   ;;  %s195_s9 = smov 48   ;;  %s196_s14 = smov 16   ;;  %vm103_vm2 = vcmask 523648   ;;  %vm124_vm3 = vcmask 392448   ;;  %s289_s0 = inlined_call_operand.vmem [shape: f32[16,4,16], index: 0, kind: input, shape index: {}]   ;;  %s290_s1 = inlined_call_operand.vmem [shape: f32[16,64], index: 1, kind: output, shape index: {}]  }
   0x1   :  { %v180_v0 = vld [vmem:[%s289_s0 + $0x1c] sm:$0xf]  ;;  %v181_v1 = vld [vmem:[%s289_s0 + $0x18] sm:$0xf]  ;;  %v182_v2 = vld [vmem:[%s289_s0 + $0x14] sm:$0xf] }
   0x2   :  { %48 = vst [vmem:[#allocation0 + $0x38] sm:$0xf] %v180_v0  ;;  %53 = vst [vmem:[#allocation0 + $0x30] sm:$0xf] %v181_v1  ;;  %v183_v3 = vld [vmem:[%s289_s0 + $0x10] sm:$0xf] }
   0x3   :  { %58 = vst [vmem:[#allocation0 + $0x28] sm:$0xf] %v182_v2  ;;  %v184_v4 = vld [vmem:[%s289_s0 + $0xc] sm:$0xf]  ;;  %v185_v5 = vld [vmem:[%s289_s0 + $0x8] sm:$0xf] }
   0x4   :  { %63 = vst [vmem:[#allocation0 + $0x20] sm:$0xf] %v183_v3  ;;  %68 = vst [vmem:[#allocation0 + $0x18] sm:$0xf] %v184_v4  ;;  %v186_v6 = vld [vmem:[%s289_s0 + $0x4] sm:$0xf] }
   0x5   :  { %73 = vst [vmem:[#allocation0 + $0x10] sm:$0xf] %v185_v5  ;;  %v78_v7 = vld [vmem:[%s289_s0] sm:$0xf]  ;;  %77 = vst [vmem:[#allocation0 + $0x8] sm:$0xf] %v186_v6 }
   0x6   :  { %79 = vst [vmem:[#allocation0] sm:$0xf] %v78_v7  ;;  %v172_v8 = vld [vmem:[%s289_s0 + $0x3c] sm:$0xf]  ;;  %v173_v9 = vld [vmem:[%s289_s0 + $0x38] sm:$0xf] }
   0x7   :  { %8 = vst [vmem:[#allocation0 + $0x78] sm:$0xf] %v172_v8  ;;  %13 = vst [vmem:[#allocation0 + $0x70] sm:$0xf] %v173_v9  ;;  %v174_v10 = vld [vmem:[%s289_s0 + $0x34] sm:$0xf] }
   0x8   :  { %v175_v11 = vld [vmem:[%s289_s0 + $0x30] sm:$0xf]  ;;  %v176_v12 = vld [vmem:[%s289_s0 + $0x2c] sm:$0xf]  ;;  %18 = vst [vmem:[#allocation0 + $0x68] sm:$0xf] %v174_v10 }
   0x9   :  { %23 = vst [vmem:[#allocation0 + $0x60] sm:$0xf] %v175_v11  ;;  %28 = vst [vmem:[#allocation0 + $0x58] sm:$0xf] %v176_v12  ;;  %v177_v13 = vld [vmem:[%s289_s0 + $0x28] sm:$0xf] }
   0xa   :  { %v178_v14 = vld [vmem:[%s289_s0 + $0x24] sm:$0xf]  ;;  %v179_v15 = vld [vmem:[%s289_s0 + $0x20] sm:$0xf]  ;;  %33 = vst [vmem:[#allocation0 + $0x50] sm:$0xf] %v177_v13 }
   0xb   :  { %38 = vst [vmem:[#allocation0 + $0x48] sm:$0xf] %v178_v14  ;;  %43 = vst [vmem:[#allocation0 + $0x40] sm:$0xf] %v179_v15  ;;  %s194_s0 = smov 32   ;;  %vm145_vm4 = vcmask 261248  }
   0xc   :  { %v119_v16 = vld [vmem:[#allocation0 + $0x2] ss:$8 sm:$0xf0]   ;;  %v98_v17 = vld [vmem:[#allocation0 + $0x3] ss:$8 sm:$0xf0]  }
   0xd   :  { %v117_v18 = vld [vmem:[#allocation0 + $0x2] ss:$8 sm:$0xf]   ;;  %v96_v19 = vld [vmem:[#allocation0 + $0x3] ss:$8 sm:$0xf]  }
   0xe   :  { %v121_v20 = vsel %vm82_vm0, %v119_v16, %v117_v18  ;;  %v100_v21 = vsel %vm82_vm0, %v98_v17, %v96_v19  ;;  %v138_v24 = vld [vmem:[#allocation0 + $0x1] ss:$8 sm:$0xf]   ;;  %v80_v32 = vld [vmem:[#allocation0] ss:$8 sm:$0xf]  }
   0xf   :  { %122 = vrot.lane.b32.xlu1 %v121_v20, %s194_s0  ;;  %101 = vrot.lane.b32.xlu0 %v100_v21, %s195_s9  ;;  %v140_v25 = vld [vmem:[#allocation0 + $0x1] ss:$8 sm:$0xf0]   ;;  %v81_v33 = vld [vmem:[#allocation0] ss:$8 sm:$0xf0]  }
  0x10   :  { %v129_v22 = vld [vmem:[#allocation0 + $0x42] ss:$8 sm:$0xf0]   ;;  %v108_v23 = vld [vmem:[#allocation0 + $0x43] ss:$8 sm:$0xf0]   ;;  %v83_v34 = vsel %vm82_vm0, %v81_v33, %v80_v32  ;;  %v142_v38 = vsel %vm82_vm0, %v140_v25, %v138_v24 }
  0x11   :  { %v150_v31 = vld [vmem:[#allocation0 + $0x41] ss:$8 sm:$0xf0]   ;;  %v89_v36 = vld [vmem:[#allocation0 + $0x40] ss:$8 sm:$0xf0]  }
  0x12   :  { %v127_v26 = vld [vmem:[#allocation0 + $0x42] ss:$8 sm:$0xf]   ;;  %v106_v27 = vld [vmem:[#allocation0 + $0x43] ss:$8 sm:$0xf]  }
  0x13   :  { %v131_v28 = vsel %vm82_vm0, %v129_v22, %v127_v26  ;;  %v110_v29 = vsel %vm82_vm0, %v108_v23, %v106_v27  ;;  %v148_v30 = vld [vmem:[#allocation0 + $0x41] ss:$8 sm:$0xf]   ;;  %v87_v35 = vld [vmem:[#allocation0 + $0x40] ss:$8 sm:$0xf]  }
  0x14   :  { %132 = vrot.lane.b32.xlu1 %v131_v28, %s194_s0  ;;  %111 = vrot.lane.b32.xlu0 %v110_v29, %s195_s9  ;;  %v152_v37 = vsel %vm82_vm0, %v150_v31, %v148_v30  ;;  %85 = vst.msk [vmem:[%s290_s1] sm:$0xff] %vm84_vm1, %v83_v34   ;;  %v91_v39 = vsel %vm82_vm0, %v89_v36, %v87_v35 }
  0x15   :  { %187 = vst.msk [vmem:[%s290_s1 + $0x8] sm:$0xff] %vm84_vm1, %v91_v39  }
  0x18   :  { %153 = vrot.lane.b32.xlu1 %v152_v37, %s196_s14  ;;  %143 = vrot.lane.b32.xlu0 %v142_v38, %s196_s14 }
  0x81   :  { %v123_v40 = vpop.permute.xlu1 %122   ;;  %v102_v41 = vpop.permute.xlu0 %101  }
  0x82   :  { %104 = vst.msk [vmem:[%s290_s1] sm:$0xff] %vm103_vm2, %v102_v41  }
  0x83   :  { %125 = vst.msk [vmem:[%s290_s1] sm:$0xff] %vm124_vm3, %v123_v40  }
  0x86   :  { %v133_v42 = vpop.permute.xlu1 %132   ;;  %v112_v43 = vpop.permute.xlu0 %111  }
  0x87   :  { %188 = vst.msk [vmem:[%s290_s1 + $0x8] sm:$0xff] %vm103_vm2, %v112_v43  }
  0x88   :  { %189 = vst.msk [vmem:[%s290_s1 + $0x8] sm:$0xff] %vm124_vm3, %v133_v42  }
  0x8a   :  { %v154_v44 = vpop.permute.xlu1 %153   ;;  %v144_v45 = vpop.permute.xlu0 %143  }
  0x8b   :  { %190 = vst.msk [vmem:[%s290_s1 + $0x8] sm:$0xff] %vm145_vm4, %v154_v44   ;;  %146 = vst.msk [vmem:[%s290_s1] sm:$0xff] %vm145_vm4, %v144_v45  }

// kernel: deepfm_forward.1
= control target key start
LH: loop header
LB: loop body
LE: loop exit
PB: predicated region body
PF: predicated region fallthrough
CT: control target
= control target key end

     0   :  { %v1086_v3 = vmov 0.0   ;;  %v1087_v4 = vmov 0   ;;  %vm59_vm0 = vcmask 523264   ;;  %vm655_vm1 = vcmask 130048   ;;  %s1465_s0 = inlined_call_operand.vmem [shape: f32[64,256], index: 0, kind: input, shape index: {}]   ;;  %s1466_s4 = inlined_call_operand.vmem [shape: f32[64,1], index: 4, kind: input, shape index: {}]   ;;  %s1467_s3 = inlined_call_operand.vmem [shape: f32[64,64], index: 3, kind: input, shape index: {}]   ;;  %s1468_s6 = inlined_call_operand.vmem [shape: f32[16,1], index: 6, kind: input, shape index: {}]   ;;  %s1469_s8 = inlined_call_operand.vmem [shape: f32[16,1], index: 8, kind: input, shape index: {}]   ;;  %s1470_s10 = inlined_call_operand.vmem [shape: f32[16,1], index: 10, kind: input, shape index: {}]   ;;  %s1471_s11 = inlined_call_operand.vmem [shape: f32[16,1], index: 11, kind: input, shape index: {}]   ;;  %s1472_s2 = inlined_call_operand.vmem [shape: f32[16,64], index: 2, kind: input, shape index: {}]   ;;  %s1473_s5 = inlined_call_operand.vmem [shape: f32[16,64], index: 5, kind: input, shape index: {}]   ;;  %s1474_s7 = inlined_call_operand.vmem [shape: f32[16,16], index: 7, kind: input, shape index: {}]   ;;  %s1475_s9 = inlined_call_operand.vmem [shape: f32[16,16], index: 9, kind: input, shape index: {}]   ;;  %s1476_s1 = inlined_call_operand.vmem [shape: f32[1,256], index: 1, kind: input, shape index: {}]   ;;  %s1477_s12 = inlined_call_operand.vmem [shape: f32[1,256], index: 12, kind: output, shape index: {}]  }
   0x1   :  { %v42_v0 = vld [vmem:[%s1465_s0 + $0x8] sm:$0xff]  ;;  %v44_v1 = vld [vmem:[%s1465_s0 + $0x18] sm:$0xff]  ;;  %v41_v2 = vld [vmem:[%s1465_s0] sm:$0xff]  ;;  %351 = vmatprep.mubr.f32.mxu1 %v1086_v3  ;;  %1040 = vset.pattern.permute.xlu0 %v1087_v4 }
   0x2   :  { %v973_v5 = vpack.c.bf16 %v44_v1, %v42_v0  ;;  %v162_v6 = vmul.f32 %v42_v0, %v42_v0  ;;  %v164_v7 = vmul.f32 %v44_v1, %v44_v1  ;;  %v43_v8 = vld [vmem:[%s1465_s0 + $0x10] sm:$0xff]  ;;  %v161_v9 = vmul.f32 %v41_v2, %v41_v2  ;;  %v46_v10 = vld [vmem:[%s1465_s0 + $0x28] sm:$0xff]  ;;  %v48_v11 = vld [vmem:[%s1465_s0 + $0x38] sm:$0xff]  ;;  %1041 = vset.pattern.permute.xlu1 %v1087_v4 }
   0x3   :  { %v975_v12 = vpack.c.bf16 %v43_v8, %v41_v2  ;;  %v163_v13 = vmul.f32 %v43_v8, %v43_v8  ;;  %v977_v14 = vpack.c.bf16 %v48_v11, %v46_v10  ;;  %v166_v15 = vmul.f32 %v46_v10, %v46_v10  ;;  %v45_v16 = vld [vmem:[%s1465_s0 + $0x20] sm:$0xff]  ;;  %v47_v17 = vld [vmem:[%s1465_s0 + $0x30] sm:$0xff]  ;;  %v50_v18 = vld [vmem:[%s1465_s0 + $0x48] sm:$0xff]  ;;  %130 = vmatprep.mubr.f32.mxu0 %v1086_v3 }
   0x4   :  { %v190_v19 = vadd.f32 %v164_v7, %v162_v6  ;;  %990 = vmatprep.subr.bf16.mxu1 %v973_v5  ;;  %v168_v20 = vmul.f32 %v48_v11, %v48_v11  ;;  %v165_v21 = vmul.f32 %v45_v16, %v45_v16  ;;  %v52_v22 = vld [vmem:[%s1465_s0 + $0x58] sm:$0xff]  ;;  %v979_v24 = vpack.c.bf16 %v47_v17, %v45_v16  ;;  %v49_v29 = vld [vmem:[%s1465_s0 + $0x40] sm:$0xff]  ;;  %v51_v30 = vld [vmem:[%s1465_s0 + $0x50] sm:$0xff] }
   0x5   :  { %v177_v23 = vadd.f32 %v163_v13, %v161_v9  ;;  %992 = vmatpush1.bf16.msra.mxu1 %v975_v12  ;;  %v167_v25 = vmul.f32 %v47_v17, %v47_v17  ;;  %v981_v27 = vpack.c.bf16 %v52_v22, %v50_v18  ;;  %v170_v28 = vmul.f32 %v50_v18, %v50_v18  ;;  %v54_v33 = vld [vmem:[%s1465_s0 + $0x68] sm:$0xff]  ;;  %v56_v34 = vld [vmem:[%s1465_s0 + $0x78] sm:$0xff]  ;;  %v215_v40 = vld [vmem:[%s1466_s4] sm:$0xff] }
   0x6   :  { %v191_v26 = vadd.f32 %v190_v19, %v166_v15  ;;  %994 = vmatprep.subr.bf16.mxu1 %v977_v14  ;;  %v169_v32 = vmul.f32 %v49_v29, %v49_v29  ;;  %974 = vmatprep.subr.bf16.mxu0 %v973_v5  ;;  %v172_v36 = vmul.f32 %v52_v22, %v52_v22  ;;  %v217_v41 = vld [vmem:[%s1466_s4 + $0x10] sm:$0xff]  ;;  %v53_v45 = vld [vmem:[%s1465_s0 + $0x60] sm:$0xff]  ;;  %v216_v49 = vld [vmem:[%s1466_s4 + $0x8] sm:$0xff] }
   0x7   :  { %v178_v31 = vadd.f32 %v177_v23, %v165_v21  ;;  %976 = vmatpush1.bf16.msra.mxu0 %v975_v12  ;;  %v983_v38 = vpack.c.bf16 %v51_v30, %v49_v29  ;;  %v171_v39 = vmul.f32 %v51_v30, %v51_v30  ;;  %v985_v43 = vpack.c.bf16 %v56_v34, %v54_v33  ;;  %v55_v46 = vld [vmem:[%s1465_s0 + $0x70] sm:$0xff]  ;;  %v218_v52 = vld [vmem:[%s1466_s4 + $0x18] sm:$0xff]  ;;  %v219_v58 = vld [vmem:[%s1466_s4 + $0x20] sm:$0xff] }
   0x8   :  { %v192_v35 = vadd.f32 %v191_v26, %v168_v20  ;;  %978 = vmatprep.subr.bf16.mxu0 %v977_v14  ;;  %v174_v44 = vmul.f32 %v54_v33, %v54_v33  ;;  %225 = vperm.xlu0 %1040, %v215_v40   ;;  %v173_v48 = vmul.f32 %v53_v45, %v53_v45  ;;  %v220_v60 = vld [vmem:[%s1466_s4 + $0x28] sm:$0xff]  ;;  %v207_v62 = vld [vmem:[%s1467_s3] sm:$0xff]  ;;  %v221_v63 = vld [vmem:[%s1466_s4 + $0x30] sm:$0xff] }
   0x9   :  { %v179_v37 = vadd.f32 %v178_v31, %v167_v25  ;;  %996 = vmatpush1.bf16.msra.mxu1 %v979_v24  ;;  %235 = vperm.xlu1 %1041, %v217_v41   ;;  %v176_v51 = vmul.f32 %v56_v34, %v56_v34  ;;  %v987_v54 = vpack.c.bf16 %v55_v46, %v53_v45  ;;  %v222_v0 = vld [vmem:[%s1466_s4 + $0x38] sm:$0xff]  ;;  %v208_v1 = vld [vmem:[%s1467_s3 + $0x8] sm:$0xff]  ;;  %v546_v2 = vld [vmem:[%s1468_s6] sm:$0xff] }
   0xa   :  { %v193_v42 = vadd.f32 %v192_v35, %v170_v28  ;;  %998 = vmatprep.subr.bf16.mxu1 %v981_v27  ;;  %v175_v55 = vmul.f32 %v55_v46, %v55_v46  ;;  %v547_v4 = vld [vmem:[%s1468_s6 + $0x8] sm:$0xff]  ;;  %v209_v5 = vld [vmem:[%s1467_s3 + $0x10] sm:$0xff]  ;;  %v643_v6 = vld [vmem:[%s1469_s8] sm:$0xff] }
   0xb   :  { %v180_v47 = vadd.f32 %v179_v37, %v169_v32  ;;  %980 = vmatpush1.bf16.msra.mxu0 %v979_v24  ;;  %v644_v7 = vld [vmem:[%s1469_s8 + $0x8] sm:$0xff]  ;;  %v210_v8 = vld [vmem:[%s1467_s3 + $0x18] sm:$0xff]  ;;  %v777_v9 = vld [vmem:[%s1470_s10] sm:$0xff] }
   0xc   :  { %v194_v50 = vadd.f32 %v193_v42, %v172_v36  ;;  %982 = vmatprep.subr.bf16.mxu0 %v981_v27  ;;  %230 = vperm.xlu0 %1040, %v216_v49   ;;  %v778_v10 = vld [vmem:[%s1470_s10 + $0x8] sm:$0xff]  ;;  %v211_v11 = vld [vmem:[%s1467_s3 + $0x20] sm:$0xff]  ;;  %v213_v15 = vld [vmem:[%s1467_s3 + $0x30] sm:$0xff] }
   0xd   :  { %v181_v53 = vadd.f32 %v180_v47, %v171_v39  ;;  %1000 = vmatpush1.bf16.msra.mxu1 %v983_v38  ;;  %240 = vperm.xlu1 %1041, %v218_v52   ;;  %v872_v12 = vld [vmem:[%s1471_s11] sm:$0xff]  ;;  %v873_v13 = vld [vmem:[%s1471_s11 + $0x8] sm:$0xff]  ;;  %v214_v16 = vld [vmem:[%s1467_s3 + $0x38] sm:$0xff] }
   0xe   :  { %v195_v56 = vadd.f32 %v194_v50, %v174_v44  ;;  %1002 = vmatprep.subr.bf16.mxu1 %v985_v43  ;;  %v212_v14 = vld [vmem:[%s1467_s3 + $0x28] sm:$0xff]  ;;  %v57_v17 = vld [vmem:[%s1472_s2] sm:$0xff] }
   0xf   :  { %v182_v57 = vadd.f32 %v181_v53, %v173_v48  ;;  %984 = vmatpush1.bf16.msra.mxu0 %v983_v38  ;;  %v58_v18 = vld [vmem:[%s1472_s2 + $0x8] sm:$0xff] }
  0x10   :  { %v1219_v59 = vadd.f32 %v195_v56, %v176_v51  ;;  %986 = vmatprep.subr.bf16.mxu0 %v985_v43  ;;  %245 = vperm.xlu0 %1040, %v219_v58  }
  0x11   :  { %v1224_v61 = vadd.f32 %v182_v57, %v175_v55  ;;  %1004 = vmatpush1.bf16.msra.mxu1 %v987_v54  ;;  %250 = vperm.xlu1 %1041, %v220_v60  }
  0x13   :  { %988 = vmatpush1.bf16.msra.mxu0 %v987_v54 }
  0x14   :  { %958 = vmatmul.mubr.msk.f32.vlgmr.msra.gmra.mrb[0].mxu1 %vm59_vm0, %v207_v62  ;;  %255 = vperm.xlu0 %1040, %v221_v63  }
  0x15   :  { %357 = vmatprep.mubr.f32.mxu1 %v1086_v3  ;;  %260 = vperm.xlu1 %1041, %v222_v0  }
  0x16   :  { %956 = vmatmul.mubr.msk.f32.vlgmr.msra.gmra.mrb[0].mxu0 %vm59_vm0, %v57_v17 }
  0x17   :  { %136 = vmatprep.mubr.f32.mxu0 %v1086_v3 }
  0x18   :  { %959 = vmatmul.mubr.msk.f32.gmra.mrb[2].mxu1 %vm59_vm0, %v208_v1  ;;  %550 = vperm.xlu0 %1040, %v546_v2  }
  0x19   :  { %363 = vmatprep.mubr.f32.mxu1 %v1086_v3  ;;  %555 = vperm.xlu1 %1041, %v547_v4  }
  0x1a   :  { %957 = vmatmul.mubr.msk.f32.gmra.mrb[2].mxu0 %vm59_vm0, %v58_v18 }
  0x1b   :  { %628 = vmatprep.mubr.f32.mxu0 %v1086_v3 }
  0x1c   :  { %960 = vmatmul.mubr.msk.f32.gmra.mrb[4].mxu1 %vm59_vm0, %v209_v5  ;;  %647 = vperm.xlu0 %1040, %v643_v6  }
  0x1d   :  { %369 = vmatprep.mubr.f32.mxu1 %v1086_v3  ;;  %652 = vperm.xlu1 %1041, %v644_v7  }
  0x20   :  { %961 = vmatmul.mubr.msk.f32.gmra.mrb[6].mxu1 %vm59_vm0, %v210_v8  ;;  %781 = vperm.xlu0 %1040, %v777_v9  }
  0x21   :  { %375 = vmatprep.mubr.f32.mxu1 %v1086_v3  ;;  %786 = vperm.xlu1 %1041, %v778_v10  }
  0x24   :  { %962 = vmatmul.mubr.msk.f32.gmra.mrb[8].mxu1 %vm59_vm0, %v211_v11  ;;  %876 = vperm.xlu0 %1040, %v872_v12  }
  0x25   :  { %381 = vmatprep.mubr.f32.mxu1 %v1086_v3  ;;  %881 = vperm.xlu1 %1041, %v873_v13  }
  0x28   :  { %963 = vmatmul.mubr.msk.f32.gmra.mrb[10].mxu1 %vm59_vm0, %v212_v14 }
  0x29   :  { %387 = vmatprep.mubr.f32.mxu1 %v1086_v3 }
  0x2c   :  { %964 = vmatmul.mubr.msk.f32.gmra.mrb[12].mxu1 %vm59_vm0, %v213_v15 }
  0x2d   :  { %393 = vmatprep.mubr.f32.mxu1 %v1086_v3 }
  0x30   :  { %965 = vmatmul.mubr.msk.f32.gmra.mrb[14].mxu1 %vm59_vm0, %v214_v16 }
  0x31   :  { %634 = vmatprep.mubr.f32.mxu1 %v1086_v3 }
  0x87   :  { %v226_v19 = vpop.permute.xlu0 %225 }
  0x88   :  { %v236_v31 = vpop.permute.xlu1 %235 }
  0x8b   :  { %v231_v25 = vpop.permute.xlu0 %230 }
  0x8c   :  { %v241_v48 = vpop.permute.xlu1 %240 }
  0x8f   :  { %v246_v1 = vpop.permute.xlu0 %245 }
  0x90   :  { %v251_v18 = vpop.permute.xlu1 %250 }
  0xe7   :  { %v353_v20 = vpop.f32.mrb[0].mxu1 }
  0xe8   :  { %v1306_v21 = vadd.f32 %v353_v20, %v226_v19  ;;  %v355_v22 = vpop.f32.mrb[1].mxu1 }
  0xe9   :  { %v1308_v23 = vadd.f32 %v355_v22, %v226_v19 }
  0xea   :  { %v400_v24 = vmul.f32 %v1306_v21, %v1306_v21 }
  0xeb   :  { %v401_v26 = vmul.f32 %v1308_v23, %v1308_v23  ;;  %v359_v27 = vpop.f32.mrb[2].mxu1 }
  0xec   :  { %v416_v28 = vmul.f32 %v400_v24, %v1306_v21  ;;  %v1315_v29 = vadd.f32 %v359_v27, %v231_v25  ;;  %v361_v30 = vpop.f32.mrb[3].mxu1 }
  0xed   :  { %v417_v32 = vmul.f32 %v401_v26, %v1308_v23  ;;  %v1318_v33 = vadd.f32 %v361_v30, %v231_v25 }
  0xee   :  { %v432_v34 = vmul.f32 0.044715, %v416_v28  ;;  %v402_v35 = vmul.f32 %v1315_v29, %v1315_v29 }
  0xef   :  { %v433_v36 = vmul.f32 0.044715, %v417_v32  ;;  %v403_v37 = vmul.f32 %v1318_v33, %v1318_v33  ;;  %v365_v38 = vpop.f32.mrb[4].mxu1 }
  0xf0   :  { %v448_v39 = vadd.f32 %v432_v34, %v1306_v21  ;;  %v418_v40 = vmul.f32 %v402_v35, %v1315_v29  ;;  %v1326_v41 = vadd.f32 %v365_v38, %v236_v31  ;;  %v367_v42 = vpop.f32.mrb[5].mxu1  ;;  %v256_v38 = vpop.permute.xlu0 %255 }
  0xf1   :  { %v419_v43 = vmul.f32 %v403_v37, %v1318_v33  ;;  %v1329_v44 = vadd.f32 %v367_v42, %v236_v31  ;;  %v449_v49 = vadd.f32 %v433_v36, %v1308_v23 }
  0xf2   :  { %v464_v45 = vmul.f32 0.7978846, %v448_v39  ;;  %v434_v46 = vmul.f32 0.044715, %v418_v40  ;;  %v404_v47 = vmul.f32 %v1326_v41, %v1326_v41 }
  0xf3   :  { %v435_v50 = vmul.f32 0.044715, %v419_v43  ;;  %v405_v51 = vmul.f32 %v1329_v44, %v1329_v44  ;;  %v371_v52 = vpop.f32.mrb[6].mxu1  ;;  %v465_v2 = vmul.f32 0.7978846, %v449_v49 }
  0xf4   :  { %1042 = vtanh.f32 %v464_v45  ;;  %v450_v53 = vadd.f32 %v434_v46, %v1315_v29  ;;  %v420_v54 = vmul.f32 %v404_v47, %v1326_v41  ;;  %v1338_v55 = vadd.f32 %v371_v52, %v241_v48  ;;  %v373_v56 = vpop.f32.mrb[7].mxu1 }
  0xf5   :  { %v451_v57 = vadd.f32 %v435_v50, %v1318_v33  ;;  %v421_v58 = vmul.f32 %v405_v51, %v1329_v44  ;;  %v1342_v60 = vadd.f32 %v373_v56, %v241_v48 }
  0xf6   :  { %v466_v62 = vmul.f32 0.7978846, %v450_v53  ;;  %v436_v63 = vmul.f32 0.044715, %v420_v54  ;;  %v406_v0 = vmul.f32 %v1338_v55, %v1338_v55 }
  0xf7   :  { %v437_v4 = vmul.f32 0.044715, %v421_v58  ;;  %v407_v5 = vmul.f32 %v1342_v60, %v1342_v60  ;;  %v377_v6 = vpop.f32.mrb[8].mxu1  ;;  %v467_v11 = vmul.f32 0.7978846, %v451_v57 }
  0xf8   :  { %1044 = vtanh.f32 %v466_v62  ;;  %v452_v7 = vadd.f32 %v436_v63, %v1326_v41  ;;  %v422_v8 = vmul.f32 %v406_v0, %v1338_v55  ;;  %v1350_v9 = vadd.f32 %v377_v6, %v246_v1  ;;  %v379_v10 = vpop.f32.mrb[9].mxu1 }
  0xf9   :  { %v453_v12 = vadd.f32 %v437_v4, %v1329_v44  ;;  %v423_v13 = vmul.f32 %v407_v5, %v1342_v60  ;;  %v1354_v14 = vadd.f32 %v379_v10, %v246_v1  ;;  %1046 = vtanh.f32 %v465_v2  ;;  %v261_v4 = vpop.permute.xlu1 %260 }
  0xfa   :  { %v468_v15 = vmul.f32 0.7978846, %v452_v7  ;;  %v438_v16 = vmul.f32 0.044715, %v422_v8  ;;  %v408_v17 = vmul.f32 %v1350_v9, %v1350_v9 }
  0xfb   :  { %v469_v19 = vmul.f32 0.7978846, %v453_v12  ;;  %v439_v20 = vmul.f32 0.044715, %v423_v13  ;;  %v409_v22 = vmul.f32 %v1354_v14, %v1354_v14  ;;  %v383_v24 = vpop.f32.mrb[10].mxu1 }
  0xfc   :  { %1048 = vtanh.f32 %v468_v15  ;;  %v454_v25 = vadd.f32 %v438_v16, %v1338_v55  ;;  %v424_v26 = vmul.f32 %v408_v17, %v1350_v9  ;;  %v1362_v27 = vadd.f32 %v383_v24, %v251_v18  ;;  %v385_v28 = vpop.f32.mrb[11].mxu1 }
  0xfd   :  { %1050 = vtanh.f32 %v467_v11  ;;  %v455_v30 = vadd.f32 %v439_v20, %v1342_v60  ;;  %v425_v31 = vmul.f32 %v409_v22, %v1354_v14  ;;  %v1366_v32 = vadd.f32 %v385_v28, %v251_v18 }
  0xfe   :  { %v1043_v34 = vpop.eup %1042  ;;  %1052 = vtanh.f32 %v469_v19  ;;  %v470_v35 = vmul.f32 0.7978846, %v454_v25  ;;  %v440_v36 = vmul.f32 0.044715, %v424_v26  ;;  %v410_v37 = vmul.f32 %v1362_v27, %v1362_v27 }
  0xff   :  { %v496_v39 = vadd.f32 1.0, %v1043_v34  ;;  %v471_v40 = vmul.f32 0.7978846, %v455_v30  ;;  %v441_v42 = vmul.f32 0.044715, %v425_v31  ;;  %v411_v43 = vmul.f32 %v1366_v32, %v1366_v32  ;;  %v389_v45 = vpop.f32.mrb[12].mxu1 }
 0x100   :  { %1054 = vtanh.f32 %v470_v35  ;;  %v456_v46 = vadd.f32 %v440_v36, %v1350_v9  ;;  %v426_v47 = vmul.f32 %v410_v37, %v1362_v27  ;;  %v1374_v48 = vadd.f32 %v389_v45, %v256_v38  ;;  %v391_v49 = vpop.f32.mrb[13].mxu1 }
 0x101   :  { %v512_v50 = vmul.f32 0.5, %v496_v39  ;;  %1056 = vtanh.f32 %v471_v40  ;;  %v457_v51 = vadd.f32 %v441_v42, %v1354_v14  ;;  %v427_v52 = vmul.f32 %v411_v43, %v1366_v32 }
 0x102   :  { %v1045_v53 = vpop.eup %1044  ;;  %v472_v54 = vmul.f32 0.7978846, %v456_v46  ;;  %v442_v56 = vmul.f32 0.044715, %v426_v47  ;;  %v412_v57 = vmul.f32 %v1374_v48, %v1374_v48  ;;  %v1380_v58 = vadd.f32 %v391_v49, %v256_v38 }
 0x103   :  { %v528_v62 = vmul.f32 %v512_v50, %v1306_v21  ;;  %v498_v63 = vadd.f32 1.0, %v1045_v53  ;;  %v473_v0 = vmul.f32 0.7978846, %v457_v51  ;;  %v443_v1 = vmul.f32 0.044715, %v427_v52  ;;  %v395_v2 = vpop.f32.mrb[14].mxu1  ;;  %v1047_v10 = vpop.eup %1046 }
 0x104   :  { %1058 = vtanh.f32 %v472_v54  ;;  %v458_v5 = vadd.f32 %v442_v56, %v1362_v27  ;;  %v428_v6 = vmul.f32 %v412_v57, %v1374_v48  ;;  %v413_v7 = vmul.f32 %v1380_v58, %v1380_v58  ;;  %v397_v8 = vpop.f32.mrb[15].mxu1 }
 0x105   :  { %v514_v11 = vmul.f32 0.5, %v498_v63  ;;  %1060 = vtanh.f32 %v473_v0  ;;  %v459_v12 = vadd.f32 %v443_v1, %v1366_v32  ;;  %v1388_v21 = vadd.f32 %v395_v2, %v261_v4 }
 0x106   :  { %v1049_v13 = vpop.eup %1048  ;;  %v474_v15 = vmul.f32 0.7978846, %v458_v5  ;;  %v444_v16 = vmul.f32 0.044715, %v428_v6  ;;  %v429_v17 = vmul.f32 %v413_v7, %v1380_v58  ;;  %v1391_v18 = vadd.f32 %v397_v8, %v261_v4 }
 0x107   :  { %v1051_v19 = vpop.eup %1050  ;;  %v530_v20 = vmul.f32 %v514_v11, %v1315_v29  ;;  %v500_v22 = vadd.f32 1.0, %v1049_v13  ;;  %v475_v24 = vmul.f32 0.7978846, %v459_v12  ;;  %v414_v25 = vmul.f32 %v1388_v21, %v1388_v21 }
 0x108   :  { %v1053_v26 = vpop.eup %1052  ;;  %1062 = vtanh.f32 %v474_v15  ;;  %v460_v28 = vadd.f32 %v444_v16, %v1374_v48  ;;  %v445_v30 = vmul.f32 0.044715, %v429_v17  ;;  %v415_v31 = vmul.f32 %v1391_v18, %v1391_v18 }
 0x109   :  { %v516_v34 = vmul.f32 0.5, %v500_v22  ;;  %1064 = vtanh.f32 %v475_v24  ;;  %v430_v35 = vmul.f32 %v414_v25, %v1388_v21  ;;  %v497_v36 = vadd.f32 1.0, %v1047_v10 }
 0x10a   :  { %v1055_v37 = vpop.eup %1054  ;;  %v476_v29 = vmul.f32 0.7978846, %v460_v28  ;;  %v461_v38 = vadd.f32 %v445_v30, %v1380_v58  ;;  %v431_v39 = vmul.f32 %v415_v31, %v1391_v18  ;;  %v499_v40 = vadd.f32 1.0, %v1051_v19 }
 0x10b   :  { %v1057_v42 = vpop.eup %1056  ;;  %v532_v43 = vmul.f32 %v516_v34, %v1326_v41  ;;  %v502_v45 = vadd.f32 1.0, %v1055_v37  ;;  %v446_v46 = vmul.f32 0.044715, %v430_v35  ;;  %v513_v47 = vmul.f32 0.5, %v497_v36 }
 0x10c   :  { %1066 = vtanh.f32 %v476_v29  ;;  %v477_v49 = vmul.f32 0.7978846, %v461_v38  ;;  %v447_v50 = vmul.f32 0.044715, %v431_v39  ;;  %v515_v51 = vmul.f32 0.5, %v499_v40 }
 0x10d   :  { %v518_v52 = vmul.f32 0.5, %v502_v45  ;;  %v462_v53 = vadd.f32 %v446_v46, %v1388_v21  ;;  %v529_v54 = vmul.f32 %v513_v47, %v1308_v23  ;;  %v1007_v56 = vpack.c.bf16 %v530_v20, %v528_v62 }
 0x10e   :  { %v1059_v57 = vpop.eup %1058  ;;  %1068 = vtanh.f32 %v477_v49  ;;  %v463_v63 = vadd.f32 %v447_v50, %v1391_v18  ;;  %v531_v0 = vmul.f32 %v515_v51, %v1318_v33  ;;  %v501_v41 = vadd.f32 1.0, %v1053_v26  ;;  %v544_v49 = vld [vmem:[%s1473_s5] sm:$0xff] }
 0x10f   :  { %v1061_v1 = vpop.eup %1060  ;;  %v534_v2 = vmul.f32 %v518_v52, %v1338_v55  ;;  %v504_v4 = vadd.f32 1.0, %v1059_v57  ;;  %v478_v5 = vmul.f32 0.7978846, %v462_v53  ;;  %v503_v6 = vadd.f32 1.0, %v1057_v42 }
 0x110   :  { %v479_v7 = vmul.f32 0.7978846, %v463_v63  ;;  %v1005_v8 = vpack.c.bf16 %v531_v0, %v529_v54  ;;  %v517_v10 = vmul.f32 0.5, %v501_v41  ;;  %v505_v11 = vadd.f32 1.0, %v1061_v1 }
 0x111   :  { %1070 = vtanh.f32 %v478_v5  ;;  %v519_v23 = vmul.f32 0.5, %v503_v6  ;;  %v1011_v62 = vpack.c.bf16 %v534_v2, %v532_v43  ;;  %v520_v33 = vmul.f32 0.5, %v504_v4 }
 0x112   :  { %v1063_v12 = vpop.eup %1062  ;;  %1072 = vtanh.f32 %v479_v7  ;;  %1006 = vmatprep.subr.bf16.mxu0 %v1005_v8  ;;  %1029 = vmatprep.subr.bf16.mxu1 %v1005_v8  ;;  %v533_v55 = vmul.f32 %v517_v10, %v1329_v44  ;;  %v521_v19 = vmul.f32 0.5, %v505_v11 }
 0x113   :  { %v1065_v13 = vpop.eup %1064  ;;  %v506_v15 = vadd.f32 1.0, %v1063_v12  ;;  %1008 = vmatpush1.bf16.msra.mxu0 %v1007_v56  ;;  %1033 = vmatpush1.bf16.msra.mxu1 %v1007_v56  ;;  %v535_v16 = vmul.f32 %v519_v23, %v1342_v60  ;;  %v536_v26 = vmul.f32 %v520_v33, %v1350_v9 }
 0x114   :  { %v507_v17 = vadd.f32 1.0, %v1065_v13  ;;  %v537_v44 = vmul.f32 %v521_v19, %v1354_v14 }
 0x115   :  { %v522_v20 = vmul.f32 0.5, %v506_v15  ;;  %v1009_v22 = vpack.c.bf16 %v535_v16, %v533_v55 }
 0x116   :  { %v1067_v24 = vpop.eup %1066  ;;  %v523_v25 = vmul.f32 0.5, %v507_v17 }
 0x117   :  { %v538_v28 = vmul.f32 %v522_v20, %v1362_v27  ;;  %1010 = vmatprep.subr.bf16.mxu0 %v1009_v22  ;;  %1030 = vmatprep.subr.bf16.mxu1 %v1009_v22  ;;  %v508_v31 = vadd.f32 1.0, %v1067_v24 }
 0x118   :  { %v1069_v30 = vpop.eup %1068  ;;  %1012 = vmatpush1.bf16.msra.mxu0 %v1011_v62  ;;  %1034 = vmatpush1.bf16.msra.mxu1 %v1011_v62  ;;  %v539_v60 = vmul.f32 %v523_v25, %v1366_v32 }
 0x119   :  { %v1015_v34 = vpack.c.bf16 %v538_v28, %v536_v26  ;;  %v509_v35 = vadd.f32 1.0, %v1069_v30  ;;  %v524_v38 = vmul.f32 0.5, %v508_v31  ;;  %v551_v28 = vpop.permute.xlu0 %550  ;;  %v556_v30 = vpop.permute.xlu1 %555 }
 0x11a   :  { %v1013_v36 = vpack.c.bf16 %v539_v60, %v537_v44 }
 0x11b   :  { %v1071_v37 = vpop.eup %1070  ;;  %v525_v27 = vmul.f32 0.5, %v509_v35  ;;  %v540_v43 = vmul.f32 %v524_v38, %v1374_v48  ;;  %v545_v48 = vld [vmem:[%s1473_s5 + $0x8] sm:$0xff] }
 0x11c   :  { %v1073_v29 = vpop.eup %1072  ;;  %v510_v39 = vadd.f32 1.0, %v1071_v37  ;;  %1014 = vmatprep.subr.bf16.mxu0 %v1013_v36  ;;  %1031 = vmatprep.subr.bf16.mxu1 %v1013_v36 }
 0x11d   :  { %1016 = vmatpush1.bf16.msra.mxu0 %v1015_v34  ;;  %1035 = vmatpush1.bf16.msra.mxu1 %v1015_v34  ;;  %v511_v9 = vadd.f32 1.0, %v1073_v29  ;;  %v541_v32 = vmul.f32 %v525_v27, %v1380_v58  ;;  %v184_v58 = vrot.slane %v1224_v61, 4  ;;  %v642_v27 = vld [vmem:[%s1474_s7 + $0x8] sm:$0xff] }
 0x11e   :  { %v526_v40 = vmul.f32 0.5, %v510_v39 }
 0x11f   :  { %v527_v42 = vmul.f32 0.5, %v511_v9  ;;  %v185_v51 = vadd.f32 %v184_v58, %v1224_v61  ;;  %v641_v9 = vld [vmem:[%s1474_s7] sm:$0xff] }
 0x120   :  { %v542_v14 = vmul.f32 %v526_v40, %v1388_v21  ;;  %v197_v21 = vrot.slane %v1219_v59, 4  ;;  %v648_v40 = vpop.permute.xlu0 %647 }
 0x121   :  { %v543_v45 = vmul.f32 %v527_v42, %v1391_v18  ;;  %v132_v18 = vpop.f32.mrb[0].mxu0  ;;  %v186_v57 = vrot.slane %v185_v51, 2 }
 0x122   :  { %v1019_v46 = vpack.c.bf16 %v542_v14, %v540_v43  ;;  %v134_v50 = vpop.f32.mrb[1].mxu0  ;;  %v198_v52 = vadd.f32 %v197_v21, %v1219_v59  ;;  %v143_v53 = vmul.f32 %v132_v18, %v132_v18 }
 0x123   :  { %v1017_v47 = vpack.c.bf16 %v543_v45, %v541_v32  ;;  %v144_v54 = vmul.f32 %v134_v50, %v134_v50  ;;  %v138_v56 = vpop.f32.mrb[2].mxu0  ;;  %v187_v5 = vadd.f32 %v186_v57, %v185_v51 }
 0x124   :  { %v145_v63 = vmul.f32 %v138_v56, %v138_v56  ;;  %v140_v0 = vpop.f32.mrb[3].mxu0  ;;  %v199_v41 = vrot.slane %v198_v52, 2 }
 0x125   :  { %1018 = vmatprep.subr.bf16.mxu0 %v1017_v47  ;;  %1032 = vmatprep.subr.bf16.mxu1 %v1017_v47  ;;  %v146_v1 = vmul.f32 %v140_v0, %v140_v0  ;;  %v188_v23 = vrot.slane %v187_v5, 1 }
 0x126   :  { %1020 = vmatpush1.bf16.msra.mxu0 %v1019_v46  ;;  %1036 = vmatpush1.bf16.msra.mxu1 %v1019_v46  ;;  %v147_v2 = vadd.f32 %v145_v63, %v143_v53  ;;  %v200_v7 = vadd.f32 %v199_v41, %v198_v52  ;;  %v653_v46 = vpop.permute.xlu1 %652 }
 0x127   :  { %v154_v4 = vadd.f32 %v146_v1, %v144_v54  ;;  %v189_v15 = vadd.f32 %v188_v23, %v187_v5 }
 0x128   :  { %v148_v6 = vrot.slane %v147_v2, 4  ;;  %v201_v62 = vrot.slane %v200_v7, 1 }
 0x129   :  { %966 = vmatmul.mubr.msk.f32.vlgmr.msra.gmra.mrb[4].mxu0 %vm59_vm0, %v544_v49  ;;  %967 = vmatmul.mubr.msk.f32.vlgmr.msra.gmra.mrb[16].mxu1 %vm59_vm0, %v545_v48  ;;  %v155_v8 = vrot.slane %v154_v4, 4 }
 0x12a   :  { %726 = vmatprep.mubr.f32.mxu0 %v1086_v3  ;;  %v149_v10 = vadd.f32 %v148_v6, %v147_v2  ;;  %v202_v16 = vadd.f32 %v201_v62, %v200_v7 }
 0x12b   :  { %v156_v11 = vadd.f32 %v155_v8, %v154_v4 }
 0x12c   :  { %v150_v61 = vrot.slane %v149_v10, 2 }
 0x12d   :  { %v157_v59 = vrot.slane %v156_v11, 2 }
 0x12e   :  { %v151_v12 = vadd.f32 %v150_v61, %v149_v10 }
 0x12f   :  { %v158_v13 = vadd.f32 %v157_v59, %v156_v11 }
 0x130   :  { %v152_v33 = vrot.slane %v151_v12, 1 }
 0x131   :  { %v159_v55 = vrot.slane %v158_v13, 1 }
 0x132   :  { %v153_v17 = vadd.f32 %v152_v33, %v151_v12 }
 0x133   :  { %v160_v19 = vadd.f32 %v159_v55, %v158_v13 }
 0x134   :  { %v203_v20 = vsub.f32 %v153_v17, %v189_v15 }
 0x135   :  { %v204_v22 = vsub.f32 %v160_v19, %v202_v16 }
 0x136   :  { %v1431_v24 = vmul.f32 0.5, %v203_v20 }
 0x137   :  { %v1433_v25 = vmul.f32 0.5, %v204_v22 }
 0x139   :  { %v905_v26 = vcombine.low %v1431_v24, %v1433_v25 }
 0x1fc   :  { %v630_v31 = vpop.f32.mrb[4].mxu0  ;;  %v636_v44 = vpop.f32.mrb[16].mxu1 }
 0x1fd   :  { %v631_v60 = vadd.f32 %v630_v31, %v551_v28  ;;  %v637_v34 = vadd.f32 %v636_v44, %v556_v30  ;;  %v632_v35 = vpop.f32.mrb[5].mxu0  ;;  %v638_v36 = vpop.f32.mrb[17].mxu1  ;;  %v775_v31 = vld [vmem:[%s1475_s9] sm:$0xff]  ;;  %v776_v44 = vld [vmem:[%s1475_s9 + $0x8] sm:$0xff] }
 0x1fe   :  { %v633_v37 = vadd.f32 %v632_v35, %v551_v28  ;;  %v639_v29 = vadd.f32 %v638_v36, %v556_v30 }
 0x1ff   :  { %v1023_v38 = vpack.c.bf16 %v637_v34, %v631_v60  ;;  %v782_v60 = vpop.permute.xlu0 %781  ;;  %v787_v34 = vpop.permute.xlu1 %786 }
 0x200   :  { %v1021_v39 = vpack.c.bf16 %v639_v29, %v633_v37 }
 0x202   :  { %1022 = vmatprep.subr.bf16.mxu0 %v1021_v39 }
 0x203   :  { %1024 = vmatpush1.bf16.msra.mxu0 %v1023_v38 }
 0x206   :  { %968 = vmatmul.mubr.msk.f32.vlgmr.msra.gmra.mrb[6].mxu0 %vm655_vm1, %v641_v9 }
 0x207   :  { %732 = vmatprep.mubr.f32.mxu0 %v1086_v3 }
 0x20a   :  { %969 = vmatmul.mubr.msk.f32.gmra.mrb[8].mxu0 %vm655_vm1, %v642_v27  ;;  %v877_v27 = vpop.permute.xlu0 %876 }
 0x20b   :  { %859 = vmatprep.mubr.f32.mxu0 %v1086_v3 }
 0x2d9   :  { %v728_v42 = vpop.f32.mrb[6].mxu0 }
 0x2da   :  { %v729_v43 = vadd.f32 %v728_v42, %v648_v40  ;;  %v730_v14 = vpop.f32.mrb[7].mxu0 }
 0x2db   :  { %v731_v32 = vadd.f32 %v730_v14, %v648_v40  ;;  %v882_v40 = vpop.permute.xlu1 %881  ;;  %v1088_v14 = vmov 1966171168  }
 0x2dc   :  { %v739_v45 = vmul.f32 %v729_v43, %v729_v43 }
 0x2dd   :  { %v740_v47 = vmul.f32 %v731_v32, %v731_v32  ;;  %v734_v49 = vpop.f32.mrb[8].mxu0 }
 0x2de   :  { %v743_v48 = vmul.f32 %v739_v45, %v729_v43  ;;  %v735_v58 = vadd.f32 %v734_v49, %v653_v46  ;;  %v736_v21 = vpop.f32.mrb[9].mxu0  ;;  %v909_v45 = vlaneseq }
 0x2df   :  { %v744_v18 = vmul.f32 %v740_v47, %v731_v32  ;;  %v737_v50 = vadd.f32 %v736_v21, %v653_v46 }
 0x2e0   :  { %v747_v51 = vmul.f32 0.044715, %v743_v48  ;;  %v741_v52 = vmul.f32 %v735_v58, %v735_v58  ;;  %vm949_vm2 = vcmp.lt.s32.totalorder %v909_v45, 256 }
 0x2e1   :  { %v748_v53 = vmul.f32 0.044715, %v744_v18  ;;  %v742_v54 = vmul.f32 %v737_v50, %v737_v50  ;;  %v910_v18 = vshrl.u32 %v909_v45, 7 }
 0x2e2   :  { %v751_v56 = vadd.f32 %v747_v51, %v729_v43  ;;  %v745_v57 = vmul.f32 %v741_v52, %v735_v58 }
 0x2e3   :  { %v752_v63 = vadd.f32 %v748_v53, %v731_v32  ;;  %v746_v0 = vmul.f32 %v742_v54, %v737_v50 }
 0x2e4   :  { %v755_v41 = vmul.f32 0.7978846, %v751_v56  ;;  %v749_v1 = vmul.f32 0.044715, %v745_v57 }
 0x2e5   :  { %v756_v2 = vmul.f32 0.7978846, %v752_v63  ;;  %v750_v4 = vmul.f32 0.044715, %v746_v0 }
 0x2e6   :  { %1074 = vtanh.f32 %v755_v41  ;;  %v753_v5 = vadd.f32 %v749_v1, %v735_v58 }
 0x2e7   :  { %1076 = vtanh.f32 %v756_v2  ;;  %v754_v6 = vadd.f32 %v750_v4, %v737_v50 }
 0x2e8   :  { %v757_v7 = vmul.f32 0.7978846, %v753_v5 }
 0x2e9   :  { %v758_v8 = vmul.f32 0.7978846, %v754_v6 }
 0x2ea   :  { %1078 = vtanh.f32 %v757_v7  ;;  %v902_v7 = vld [vmem:[%s1476_s1] sm:$0x3] }
 0x2eb   :  { %1080 = vtanh.f32 %v758_v8 }
 0x2f0   :  { %v1075_v10 = vpop.eup %1074 }
 0x2f1   :  { %v1077_v11 = vpop.eup %1076  ;;  %v763_v23 = vadd.f32 1.0, %v1075_v10 }
 0x2f2   :  { %v764_v61 = vadd.f32 1.0, %v1077_v11 }
 0x2f3   :  { %v767_v12 = vmul.f32 0.5, %v763_v23 }
 0x2f4   :  { %v1079_v62 = vpop.eup %1078  ;;  %v768_v15 = vmul.f32 0.5, %v764_v61 }
 0x2f5   :  { %v1081_v59 = vpop.eup %1080  ;;  %v765_v13 = vadd.f32 1.0, %v1079_v62  ;;  %v771_v17 = vmul.f32 %v767_v12, %v729_v43 }
 0x2f6   :  { %v766_v33 = vadd.f32 1.0, %v1081_v59  ;;  %v772_v20 = vmul.f32 %v768_v15, %v731_v32  ;;  %v907_v32 = vunpack.c.l.s4 %v1088_v14 }
 0x2f7   :  { %v769_v55 = vmul.f32 0.5, %v765_v13 }
 0x2f8   :  { %v770_v16 = vmul.f32 0.5, %v766_v33  ;;  %v908_v21 = vunpack.c.0.s8 %v907_v32 }
 0x2f9   :  { %v773_v19 = vmul.f32 %v769_v55, %v735_v58 }
 0x2fa   :  { %v774_v22 = vmul.f32 %v770_v16, %v737_v50  ;;  %v911_v54 = vsub.s32 %v908_v21, %v910_v18 }
 0x2fb   :  { %v1027_v28 = vpack.c.bf16 %v773_v19, %v771_v17 }
 0x2fc   :  { %v1025_v30 = vpack.c.bf16 %v774_v22, %v772_v20  ;;  %v912_v41 = vrot.slane %v905_v26, %v911_v54 }
 0x2fe   :  { %1026 = vmatprep.subr.bf16.mxu0 %v1025_v30  ;;  %v919_v5 = vrot.slane %v912_v41, %v911_v54 }
 0x2ff   :  { %1028 = vmatpush1.bf16.msra.mxu0 %v1027_v28 }
 0x300   :  { %v921_v10 = vadd.f32 %v919_v5, %v902_v7 }
 0x302   :  { %970 = vmatmul.mubr.msk.f32.vlgmr.msra.gmra.mrb[10].mxu0 %vm655_vm1, %v775_v31 }
 0x303   :  { %865 = vmatprep.mubr.f32.mxu0 %v1086_v3 }
 0x306   :  { %971 = vmatmul.mubr.msk.f32.gmra.mrb[12].mxu0 %vm655_vm1, %v776_v44 }
 0x3d5   :  { %v861_v35 = vpop.f32.mrb[10].mxu0 }
 0x3d6   :  { %v863_v36 = vpop.f32.mrb[11].mxu0  ;;  %v862_v37 = vadd.f32 %v861_v35, %v782_v60 }
 0x3d7   :  { %v864_v29 = vadd.f32 %v863_v36, %v782_v60 }
 0x3d8   :  { %v884_v43 = vmul.f32 %v877_v27, %v862_v37 }
 0x3d9   :  { %v867_v38 = vpop.f32.mrb[12].mxu0  ;;  %v885_v46 = vmul.f32 %v877_v27, %v864_v29 }
 0x3da   :  { %v868_v39 = vadd.f32 %v867_v38, %v787_v34  ;;  %v869_v9 = vpop.f32.mrb[13].mxu0 }
 0x3db   :  { %v870_v42 = vadd.f32 %v869_v9, %v787_v34 }
 0x3dc   :  { %v886_v3 = vmul.f32 %v882_v40, %v868_v39 }
 0x3dd   :  { %v887_v47 = vmul.f32 %v882_v40, %v870_v42 }
 0x3de   :  { %v888_v49 = vadd.f32 %v886_v3, %v884_v43 }
 0x3df   :  { %v895_v48 = vadd.f32 %v887_v47, %v885_v46 }
 0x3e0   :  { %v889_v58 = vrot.slane %v888_v49, 4 }
 0x3e1   :  { %v896_v50 = vrot.slane %v895_v48, 4 }
 0x3e2   :  { %v890_v51 = vadd.f32 %v889_v58, %v888_v49 }
 0x3e3   :  { %v897_v52 = vadd.f32 %v896_v50, %v895_v48 }
 0x3e4   :  { %v891_v53 = vrot.slane %v890_v51, 2 }
 0x3e5   :  { %v898_v56 = vrot.slane %v897_v52, 2 }
 0x3e6   :  { %v892_v57 = vadd.f32 %v891_v53, %v890_v51 }
 0x3e7   :  { %v899_v63 = vadd.f32 %v898_v56, %v897_v52 }
 0x3e8   :  { %v893_v0 = vrot.slane %v892_v57, 1 }
 0x3e9   :  { %v900_v1 = vrot.slane %v899_v63, 1 }
 0x3ea   :  { %v894_v2 = vadd.f32 %v893_v0, %v892_v57 }
 0x3eb   :  { %v901_v4 = vadd.f32 %v900_v1, %v899_v63 }
 0x3ed   :  { %v924_v6 = vcombine.low %v894_v2, %v901_v4 }
 0x3ef   :  { %v931_v8 = vrot.slane %v924_v6, %v911_v54 }
 0x3f1   :  { %v938_v11 = vrot.slane %v931_v8, %v911_v54 }
 0x3f3   :  { %v940_v23 = vadd.f32 %v938_v11, %v921_v10 }
 0x3f5   :  { %v972_v61 = vmul.f32 -1.442695, %v940_v23 }
 0x3f7   :  { %1082 = vpow2.f32 %v972_v61 }
 0x401   :  { %v1083_v62 = vpop.eup %1082 }
 0x402   :  { %v944_v59 = vadd.f32 1.0, %v1083_v62 }
 0x404   :  { %1084 = vrcp.f32 %v944_v59 }
 0x40e   :  { %v1085_v24 = vpop.eup %1084 }
 0x40f   :  { %951 = vst.msk [vmem:[%s1477_s12] sm:$0x3] %vm949_vm2, %v1085_v24 }

</bundles_post_ra>
